<compile_context>
chip_gen: v7x
topology: tpu7x:2x2x1
jax: 0.10.0
libtpu: 0.0.40
codegen_flags: <defaults>
</compile_context>

<pallas_src>
import functools

import jax
import jax.numpy as jnp
from jax.experimental import pallas as pl
from jax.experimental.pallas import tpu as pltpu


def patch_embed_kernel(p_ref, wt_ref, add_ref, o_ref):
    # p_ref:   (tn, K)  bf16 patch rows for this (n-tile, batch) grid point
    # wt_ref:  (K, E)   bf16 weight^T, grid-invariant (DMA'd once)
    # add_ref: (tn, E)  bf16 fused (conv bias + positions[1:]) rows, depends on n only
    # o_ref:   (tn, E)  output rows in activation dtype (bf16)
    proj = jnp.dot(p_ref[...], wt_ref[...], preferred_element_type=jnp.float32)
    o_ref[...] = (proj + add_ref[...].astype(jnp.float32)).astype(o_ref.dtype)


def prepare_patch_embed_params(w, b, cls_token, positions, *, compute_dtype=jnp.bfloat16):
    """One-time (init-time) parameter prep, hoisted out of the forward path.

    w: (E, C, kh, pw) conv weight; b: (E,); cls_token: (1,1,E); positions: (N+1, E).
    Returns:
      wt:      (K, E)  compute_dtype   transposed, flattened conv weight
      addend:  (N, E)  compute_dtype   conv bias + positions[1:]
      cls_row: (1, E)  float32         cls_token + positions[0]
    """
    E = w.shape[0]
    K = w.shape[1] * w.shape[2] * w.shape[3]
    wt = w.reshape(E, K).T.astype(compute_dtype)                          # (K, E)
    addend = (b.reshape(1, E) + positions[1:, :]).astype(compute_dtype)   # (N, E)
    cls_row = (cls_token.reshape(1, E) + positions[0:1, :]).astype(jnp.float32)
    return wt, addend, cls_row


def patch_embedding_forward(x, wt, addend, cls_row, *, kh, pw, pad_w,
                            tn=None, out_dtype=jnp.bfloat16):
    """x: (B, C, H, W) NCHW.  Returns (B, N+1, E) in `out_dtype`."""
    B, C, H, W = x.shape
    K, E = wt.shape

    # ---- patch extraction (layout glue; valid because stride == kernel size) ----
    x16 = x.astype(wt.dtype)                                    # fuse bf16 cast with pad
    x_pad = jnp.pad(x16, ((0, 0), (0, 0), (0, 0), (pad_w, pad_w)))
    Wp = W + 2 * pad_w
    assert H % kh == 0 and Wp % pw == 0
    Ho, Wo = H // kh, Wp // pw
    N = Ho * Wo
    assert C * kh * pw == K
    assert addend.shape == (N, E)
    patches = (
        x_pad.reshape(B, C, Ho, kh, Wo, pw)
        .transpose(0, 2, 4, 1, 3, 5)                            # (B, Ho, Wo, C, kh, pw)
        .reshape(B, N, K)
    )

    # ---- n tiling: default = full N (divides exactly, no padded rows) ----
    if tn is None or tn >= N:
        tn = N
    assert N % tn == 0 and (tn == N or tn % 8 == 0)
    n_tiles = N // tn

    # ---- VMEM budget from actual residency; keep headroom under v7x's 64 MiB ----
    isz = jnp.dtype(wt.dtype).itemsize
    osz = jnp.dtype(out_dtype).itemsize
    resident = (2 * K * E * isz          # weight (default double-buffered reservation)
                + 2 * tn * K * isz       # patch tile
                + 2 * tn * E * isz       # addend tile
                + 2 * tn * E * osz)      # output tile
    vmem_limit = min(max(int(resident * 1.25) + (4 << 20), 32 << 20), 56 << 20)

    out = pl.pallas_call(
        patch_embed_kernel,
        out_shape=jax.ShapeDtypeStruct((B, N, E), out_dtype),
        grid=(n_tiles, B),   # B innermost: weight/addend block indices constant across it
        in_specs=[
            pl.BlockSpec((None, tn, K), lambda n, b: (b, n, 0)),   # patches (per b, n)
            pl.BlockSpec((K, E), lambda n, b: (0, 0)),             # weight^T (invariant)
            pl.BlockSpec((tn, E), lambda n, b: (n, 0)),            # addend (per n only)
        ],
        out_specs=pl.BlockSpec((None, tn, E), lambda n, b: (b, n, 0)),
        compiler_params=pltpu.CompilerParams(
            dimension_semantics=("parallel", "parallel"),
            vmem_limit_bytes=vmem_limit,
        ),
    )(patches, wt, addend)

    # cls row handled outside the kernel (O(B*E), XLA fuses it with the concat).
    cls_rows = jnp.broadcast_to(cls_row.astype(out_dtype).reshape(1, 1, E), (B, 1, E))
    return jnp.concatenate([cls_rows, out], axis=1)


def reference(x, w, b, cls_token, positions, *, kh, pw, pad_w):
    """Pure-JAX f32 reference matching the PyTorch PatchEmbedding forward."""
    conv = jax.lax.conv_general_dilated(
        x, w, window_strides=(kh, pw), padding=((0, 0), (pad_w, pad_w)),
        dimension_numbers=("NCHW", "OIHW", "NCHW"))
    conv = conv + b.reshape(1, -1, 1, 1)
    B, E, Ho, Wo = conv.shape
    seq = conv.reshape(B, E, Ho * Wo).transpose(0, 2, 1)     # b e h w -> b (h w) e
    cls = jnp.broadcast_to(cls_token.reshape(1, 1, E), (B, 1, E))
    return jnp.concatenate([cls, seq], axis=1) + positions


if __name__ == "__main__":
    # Scaled-down shapes consistent with the module:
    #   PyTorch default: Conv2d(3, 2400, (50, 16), stride=(50, 16), padding=(0, 2)) on 300x300
    #   Here:            Conv2d(3,  128, ( 8,  4), stride=( 8,  4), padding=(0, 2)) on 16x16
    B, C, H, W = 2, 3, 16, 16
    KH, PW, PAD_W = 8, 4, 2
    E = 128
    Ho, Wo = H // KH, (W + 2 * PAD_W) // PW
    N = Ho * Wo                                   # 2 * 5 = 10 patches, seq = 11

    key = jax.random.PRNGKey(0)
    k1, k2, k3, k4, k5 = jax.random.split(key, 5)
    x = jax.random.normal(k1, (B, C, H, W), jnp.float32)
    w = jax.random.normal(k2, (E, C, KH, PW), jnp.float32) * 0.02
    b = jax.random.normal(k3, (E,), jnp.float32) * 0.02
    cls_token = jax.random.normal(k4, (1, 1, E), jnp.float32)
    positions = jax.random.normal(k5, (N + 1, E), jnp.float32)

    # One-time parameter prep (model init) -- not part of the per-forward path.
    wt, addend, cls_row = prepare_patch_embed_params(w, b, cls_token, positions)

    fwd = jax.jit(functools.partial(patch_embedding_forward, kh=KH, pw=PW, pad_w=PAD_W))
    out = fwd(x, wt, addend, cls_row)
    out = jax.block_until_ready(out)

    ref = reference(x, w, b, cls_token, positions, kh=KH, pw=PW, pad_w=PAD_W)
    assert out.shape == (B, N + 1, E), out.shape
    out_f32 = out.astype(jnp.float32)
    max_err = float(jnp.max(jnp.abs(out_f32 - ref)))
    # bf16 operands, bf16 addend and bf16 output store -> looser tolerance than pure f32.
    assert jnp.allclose(out_f32, ref, atol=3e-2, rtol=3e-2), max_err
    print("KERNEL_OK")
</pallas_src>

<mosaic_0001>
module attributes {stable_mosaic.version = 11 : i64} {
  func.func @patch_embed_kernel(%arg0: i32, %arg1: i32, %arg2: memref<1x10x96xbf16, #tpu.memory_space<vmem>>, %arg3: memref<96x128xbf16, #tpu.memory_space<vmem>>, %arg4: memref<10x128xbf16, #tpu.memory_space<vmem>>, %arg5: memref<1x10x128xbf16, #tpu.memory_space<vmem>>) attributes {dimension_semantics = [#tpu.dimension_semantics<parallel>, #tpu.dimension_semantics<parallel>], iteration_bounds = array<i64: 1, 2>, scalar_prefetch = 0 : i64, scratch_operands = 0 : i64, tpu.core_type = #tpu.core_type<tc>, window_params = [{transform_indices = @transform_0, window_bounds = array<i64: 1, 10, 96>}, {pipeline_mode = #tpu.pipeline_mode<synchronous>, transform_indices = @transform_1, window_bounds = array<i64: 96, 128>}, {transform_indices = @transform_2, window_bounds = array<i64: 10, 128>}, {transform_indices = @transform_3, window_bounds = array<i64: 1, 10, 128>}]} {
    %c0 = arith.constant 0 : index
    %c0_0 = arith.constant 0 : index
    %c0_1 = arith.constant 0 : index
    %0 = vector.load %arg2[%c0, %c0_0, %c0_1] : memref<1x10x96xbf16, #tpu.memory_space<vmem>>, vector<1x10x96xbf16>
    %1 = vector.shape_cast %0 : vector<1x10x96xbf16> to vector<10x96xbf16>
    %c0_2 = arith.constant 0 : index
    %c0_3 = arith.constant 0 : index
    %2 = vector.load %arg3[%c0_2, %c0_3] : memref<96x128xbf16, #tpu.memory_space<vmem>>, vector<96x128xbf16>
    %cst = arith.constant dense<0.000000e+00> : vector<10x128xf32>
    %3 = tpu.matmul %1, %2, %cst {dimension_numbers = #tpu.dot_dimension_numbers<[1], [0], [0], [1], [0, 0, 1, 1], [], []>} : vector<10x96xbf16>, vector<96x128xbf16>, vector<10x128xf32> -> vector<10x128xf32>
    %c0_4 = arith.constant 0 : index
    %c0_5 = arith.constant 0 : index
    %4 = vector.load %arg4[%c0_4, %c0_5] : memref<10x128xbf16, #tpu.memory_space<vmem>>, vector<10x128xbf16>
    %5 = arith.extf %4 : vector<10x128xbf16> to vector<10x128xf32>
    %6 = arith.addf %3, %5 : vector<10x128xf32>
    %7 = arith.truncf %6 : vector<10x128xf32> to vector<10x128xbf16>
    %c0_6 = arith.constant 0 : index
    %c0_7 = arith.constant 0 : index
    %c0_8 = arith.constant 0 : index
    %8 = vector.load %arg5[%c0_6, %c0_7, %c0_8] : memref<1x10x128xbf16, #tpu.memory_space<vmem>>, vector<1x10x128xbf16>
    %9 = vector.shape_cast %8 : vector<1x10x128xbf16> to vector<10x128xbf16>
    %10 = vector.shape_cast %7 : vector<10x128xbf16> to vector<1x10x128xbf16>
    tpu.vector_store %arg5[%c0_6, %c0_7, %c0_8], %10 {strides = array<i32>} : memref<1x10x128xbf16, #tpu.memory_space<vmem>>, vector<1x10x128xbf16>,
    return
  }
  func.func @transform_0(%arg0: i32, %arg1: i32) -> (i32, i32, i32) {
    %c0_i32 = arith.constant 0 : i32
    %c0_i32_0 = arith.constant 0 : i32
    return %arg1, %arg0, %c0_i32 : i32, i32, i32
  }
  func.func @transform_1(%arg0: i32, %arg1: i32) -> (i32, i32) {
    %c0_i32 = arith.constant 0 : i32
    %c0_i32_0 = arith.constant 0 : i32
    %c0_i32_1 = arith.constant 0 : i32
    return %c0_i32, %c0_i32_0 : i32, i32
  }
  func.func @transform_2(%arg0: i32, %arg1: i32) -> (i32, i32) {
    %c0_i32 = arith.constant 0 : i32
    %c0_i32_0 = arith.constant 0 : i32
    return %arg0, %c0_i32 : i32, i32
  }
  func.func @transform_3(%arg0: i32, %arg1: i32) -> (i32, i32, i32) {
    %c0_i32 = arith.constant 0 : i32
    %c0_i32_0 = arith.constant 0 : i32
    return %arg1, %arg0, %c0_i32 : i32, i32, i32
  }
}

</mosaic_0001>

<bundles_post_ra>
// kernel: patch_embedding_forward.1
= control target key start
LH: loop header
LB: loop body
LE: loop exit
PB: predicated region body
PF: predicated region fallthrough
CT: control target
= control target key end

     0   :  { %s577_s12 = smov 0   ;;  %s579_s13 = smov 0   ;;  %s634_s0 = inlined_call_operand.vmem [shape: bf16[2,10,96], index: 0, kind: input, shape index: {}]   ;;  %s635_s1 = inlined_call_operand.vmem [shape: bf16[96,128], index: 1, kind: input, shape index: {}]   ;;  %s636_s2 = inlined_call_operand.vmem [shape: bf16[10,128], index: 2, kind: input, shape index: {}]   ;;  %s637_s3 = inlined_call_operand.vmem [shape: bf16[2,10,128], index: 3, kind: output, shape index: {}]  }
   0x1   :  { %s581_s14 = smov 0  }
   0x2 LB: > { %s22_s15 = sadd.s32 1, %s549_s13  ;;  %p454_p0 = scmp.ge.s32.totalorder %s553_s14, 1  ;;  %s553_s14 = sphi %s581_s14, %s13_s14   ;;  %s549_s13 = sphi %s579_s13, %s639_s13   ;;  %s545_s12 = sphi %s577_s12, %s638_s12  }
   0x3   : > { %p23_p1 = scmp.ge.s32.totalorder %s22_s15, 2  ;;  %p169_p2 = scmp.lt.s32.totalorder %s553_s14, 3 }
   0x5   : > { %s641_s15 = smov (%p23_p1, %s22_s15), 0  ;;  %p170_p3 = pnand %p454_p0, %p169_p2 }
   0x6   : > { %v524_v0 = vld [vmem:[%s635_s1] sm:$0xff] (!%p170_p3)   ;;  %v555_v1 = vmov (!%p170_p3), 0.0   ;;  %v525_v2 = vld [vmem:[%s635_s1 + $0x8] sm:$0xff] (!%p170_p3)   ;;  %vm556_vm0 = vmmov (!%p170_p3), 0   ;;  %p207_p4 = scmp.lt.s32.totalorder (!%p170_p3), %s545_s12, 1  ;;  %v526_v3 = vld [vmem:[%s635_s1 + $0x10] sm:$0xff] (!%p170_p3)  }
   0x7   : > { %173 = sbr.rel (%p170_p3) target bundleno = 250 (0xfa), region = 32  ;;  %482 = vmatprep.subr.bf16.mxu0 (!%p170_p3), %v555_v1  ;;  %494 = vmatprep.mubr.msk.bf16.mxu0 (!%p170_p3), %vm556_vm0, %v555_v1  ;;  %v527_v4 = vld [vmem:[%s635_s1 + $0x18] sm:$0xff] (!%p170_p3)   ;;  %v528_v5 = vld [vmem:[%s635_s1 + $0x20] sm:$0xff] (!%p170_p3)   ;;  %v529_v6 = vld [vmem:[%s635_s1 + $0x28] sm:$0xff] (!%p170_p3)   ;;  %vm292_vm1 = vcmask (!%p170_p3), 785408  }
   0x8   : > { %483 = vmatpush3.bf16.msra.mxu0 (!%p170_p3), %v524_v0  ;;  %v247_v8 = vld [vmem:[%s636_s2] sm:$0xf] (!%p170_p3)  ;;  %v248_v9 = vld [vmem:[%s636_s2 + $0x4] sm:$0x1] (!%p170_p3) }
   0x9   : > { %484 = vmatprep.subr.bf16.mxu0 (!%p170_p3), %v555_v1  ;;  %v249_v10 = vunpack.c.l.bf16 (!%p170_p3), %v247_v8  ;;  %v250_v11 = vunpack.c.l.bf16 (!%p170_p3), %v248_v9 }
   0xc   : > { %485 = vmatpush3.bf16.msra.mxu0 (!%p170_p3), %v525_v2 }
   0xd   : > { %486 = vmatprep.subr.bf16.mxu0 (!%p170_p3), %v555_v1 }
   0xe   : > { %s643_s12 = smov (!%p207_p4, %s545_s12), 1 }
   0xf   : > { %s471_s22 = sshll.u32 %s643_s12, 3 }
  0x10   : > { %s214_s25 = scalar_lea.vmem %s634_s0, %s471_s22  ;;  %487 = vmatpush3.bf16.msra.mxu0 %v526_v3  ;;  %s230_s11 = scalar_lea.vmem %s637_s3, %s471_s22 }
  0x11   : > { %488 = vmatprep.subr.bf16.mxu0 %v555_v1  ;;  %v530_v7 = vld [vmem:[%s214_s25] sm:$0x1f]  }
  0x14   : > { %489 = vmatpush3.bf16.msra.mxu0 %v527_v4 }
  0x15   : > { %490 = vmatprep.subr.bf16.mxu0 %v555_v1 }
  0x18   : > { %491 = vmatpush3.bf16.msra.mxu0 %v528_v5 }
  0x19   : > { %492 = vmatprep.subr.bf16.mxu0 %v555_v1 }
  0x1c   : > { %493 = vmatpush3.bf16.msra.mxu0 %v529_v6 }
  0x1f   : > { %495 = vmatmul.mubr.msk.bf16.vlgmr.msra.gmra.mrb[0].mxu0 %vm292_vm1, %v530_v7 }
  0xf2   : > { %v330_v12 = vpop.f32.mrb[0].mxu0 }
  0xf3   : > { %v331_v13 = vadd.f32 %v330_v12, %v249_v10  ;;  %v496_v14 = vpop.f32.mrb[1].mxu0 }
  0xf4   : > { %v333_v15 = vpop.f32.mrb[2].mxu0 }
  0xf5   : > { %v473_v16 = vpack.c.bf16 %v331_v13, %v331_v13  ;;  %v334_v17 = vadd.f32 %v333_v15, %v250_v11  ;;  %v497_v18 = vpop.f32.mrb[3].mxu0 }
  0xf7   : > { %345 = vst [vmem:[%s230_s11] sm:$0xf] %v473_v16  ;;  %v474_v19 = vpack.c.bf16 %v334_v17, %v334_v17 }
  0xf9   : > { %346 = vst [vmem:[%s230_s11 + $0x4] sm:$0x1] %v474_v19 }
  0xfa PF: > { %s13_s14 = sadd.s32 1, %s553_s14   ;;  %s638_s12 = smov %s549_s13 }
  0xfb   : > { %p10_p5 = scmp.ge.s32.totalorder %s13_s14, 4   ;;  %s639_s13 = smov %s641_s15 }
  0xfd   :  { %12 = sbr.rel (!%p10_p5) target bundleno = 2 (0x2), region = 65 }

</bundles_post_ra>
